<compile_context>
chip_gen: v7x
topology: tpu7x:2x2x1
jax: 0.10.0
libtpu: 0.0.40
codegen_flags: <defaults>
</compile_context>

<pallas_src>
import functools
import math

import jax
import jax.numpy as jnp
from jax.experimental import pallas as pl
from jax.experimental.pallas import tpu as pltpu


# ----------------------------------------------------------------------------
# Pallas kernel: tt recurrence steps per grid invocation
# ----------------------------------------------------------------------------
def waternet2_kernel(gates_ref, qb_ref, f_ref, y_ref, s_ref, h_ref, g_ref,
                     *, nh, tt):
    t_blk = pl.program_id(1)

    @pl.when(t_blk == 0)
    def _():
        s_ref[...] = jnp.zeros_like(s_ref)
        h_ref[...] = jnp.zeros_like(h_ref)
        g_ref[...] = jnp.zeros_like(g_ref)

    # Hot gates (used >1x per step or in the output reduction): keep in vregs.
    go = gates_ref[2 * nh:3 * nh]
    gl = gates_ref[3 * nh:4 * nh]
    ga = gates_ref[4 * nh:5 * nh]
    gb = gates_ref[5 * nh:6 * nh]
    kb = gates_ref[6 * nh:7 * nh]
    qb = qb_ref[...]                     # (1, ns_tile)

    def body(i, carry):
        S0, H0, G0 = carry
        fk = f_ref[i]                    # (4, ns_tile): Ps, Pl, E, Ta
        Psk = fk[0:1]
        Plk = fk[1:2]
        Ek = fk[2:3]
        Tak = fk[3:4]

        # Once-per-step gates: reload from VMEM (vld is cheap, saves vregs).
        gm = gates_ref[0 * nh:1 * nh]
        ge = gates_ref[1 * nh:2 * nh]
        gi = gates_ref[7 * nh:8 * nh]

        S = S0 + Psk
        Sm = jnp.minimum(S0, jnp.maximum(Tak * gm, 0.0))
        H = jnp.maximum(H0 + Sm + Plk * gi - Ek * ge, 0.0)
        Q1 = jnp.maximum(H - gl, 0.0)
        Q2a = jnp.minimum(H, gl) * go
        Q2 = Q2a * (1.0 - gb)
        G = G0 + Q2a * gb
        Q3 = G * kb

        # ga is a softmax over nh (sums to 1), so qb is hoisted out of the
        # (nh, ns) tile math:  sum((Q1+Q2+Q3+qb)*ga) == sum((Q1+Q2+Q3)*ga)+qb.
        Y = jnp.sum((Q1 + Q2 + Q3) * ga, axis=0, keepdims=True) + qb
        y_ref[pl.ds(i, 1), :] = Y

        return (S - Sm, jnp.minimum(H - Q2a, gl), G - Q3)

    S, H, G = jax.lax.fori_loop(
        0, tt, body, (s_ref[...], h_ref[...], g_ref[...]))

    # Carry state to the next time block.
    s_ref[...] = S
    h_ref[...] = H
    g_ref[...] = G


# ----------------------------------------------------------------------------
# Wrapper: forcing preprocessing, gate precompute, padding, pallas_call
# ----------------------------------------------------------------------------
def waternet2_forward(x, xc, W, b, nh, tt_target=256, ns_tile=128):
    """x: (nt, ns, 4), xc: (ns, ng), W: (nh*8+2, ng), b: (nh*8+2,) -> (nt, ns)."""
    nt, ns, _ = x.shape

    x = x.astype(jnp.float32)
    xc = xc.astype(jnp.float32)
    W = W.astype(jnp.float32)
    b = b.astype(jnp.float32)

    # ---- forcing preprocessing (same as PyTorch forward) --------------------
    P, E, T1, T2 = x[:, :, 0], x[:, :, 1], x[:, :, 2], x[:, :, 3]
    Ta = (T1 + T2) / 2.0
    ratio = (T1 + T2) / (T2 - T1)
    base = 1.0 - jnp.arccos(jnp.clip(ratio, -1.0, 1.0)) / 3.1415
    rP = jnp.where(T1 >= 0, 1.0, base)
    rP = jnp.where(T2 <= 0, 0.0, rP)
    Ps = (1.0 - rP) * P
    Plq = rP * P

    # ---- one-time gate computation in XLA (K=ng matmul wastes the MXU) ------
    w = xc @ W.T + b                                   # (ns, nh*8+2)
    gm = jnp.exp(w[:, :nh]) + 1.0
    ge = jax.nn.sigmoid(w[:, nh:2 * nh]) * 2.0
    go = jax.nn.sigmoid(w[:, 2 * nh:3 * nh])
    gl = jnp.exp(w[:, 3 * nh:4 * nh] * 2.0)
    # TODO(synk): nn.Dropout on the softmax logits is identity in eval mode;
    #             training-mode dropout is not implemented.
    ga = jax.nn.softmax(w[:, 4 * nh:5 * nh], axis=1)
    gb = jax.nn.sigmoid(w[:, 5 * nh:6 * nh])
    kb = jax.nn.sigmoid(w[:, 6 * nh:7 * nh]) / 10.0
    gi = jax.nn.sigmoid(w[:, 7 * nh:8 * nh])
    qb = jnp.maximum(w[:, -1], 0.0) / nh               # (ns,)

    # (nh, ns) layout inside the kernel: hidden on sublanes, sites on lanes.
    gates = jnp.concatenate(
        [gm.T, ge.T, go.T, gl.T, ga.T, gb.T, kb.T, gi.T], axis=0)  # (8*nh, ns)

    # ---- padding / blocking --------------------------------------------------
    nt8 = ((nt + 7) // 8) * 8
    tt = min(tt_target, nt8)                 # time-block length (multiple of 8)
    nt_pad = ((nt + tt - 1) // tt) * tt
    ns_pad = ((ns + ns_tile - 1) // ns_tile) * ns_tile

    F = jnp.stack([Ps, Plq, E, Ta], axis=1)                        # (nt, 4, ns)
    F = jnp.pad(F, ((0, nt_pad - nt), (0, 0), (0, ns_pad - ns)))
    gates = jnp.pad(gates, ((0, 0), (0, ns_pad - ns)))
    qb2 = jnp.pad(qb.reshape(1, ns), ((0, 0), (0, ns_pad - ns)))

    grid = (ns_pad // ns_tile, nt_pad // tt)   # (parallel sites, sequential time)
    kern = functools.partial(waternet2_kernel, nh=nh, tt=tt)

    yout = pl.pallas_call(
        kern,
        out_shape=jax.ShapeDtypeStruct((nt_pad, ns_pad), jnp.float32),
        grid_spec=pltpu.PrefetchScalarGridSpec(
            num_scalar_prefetch=0,
            grid=grid,
            in_specs=[
                pl.BlockSpec((8 * nh, ns_tile), lambda s, t: (0, s)),   # gates
                pl.BlockSpec((1, ns_tile), lambda s, t: (0, s)),        # qb
                pl.BlockSpec((tt, 4, ns_tile), lambda s, t: (t, 0, s)), # forcings
            ],
            out_specs=pl.BlockSpec((tt, ns_tile), lambda s, t: (t, s)),
            scratch_shapes=[
                pltpu.VMEM((nh, ns_tile), jnp.float32),  # S carry
                pltpu.VMEM((nh, ns_tile), jnp.float32),  # H carry
                pltpu.VMEM((nh, ns_tile), jnp.float32),  # G carry
            ],
        ),
        compiler_params=pltpu.CompilerParams(
            dimension_semantics=("parallel", "arbitrary")),
    )(gates, qb2, F)

    return yout[:nt, :ns]


# ----------------------------------------------------------------------------
# Pure-JAX reference (semantics of the PyTorch forward, eval-mode dropout)
# ----------------------------------------------------------------------------
def waternet2_ref(x, xc, W, b, nh):
    x = x.astype(jnp.float32)
    P, E, T1, T2 = x[:, :, 0], x[:, :, 1], x[:, :, 2], x[:, :, 3]
    Ta = (T1 + T2) / 2.0
    ratio = (T1 + T2) / (T2 - T1)
    base = 1.0 - jnp.arccos(jnp.clip(ratio, -1.0, 1.0)) / 3.1415
    rP = jnp.where(T1 >= 0, 1.0, base)
    rP = jnp.where(T2 <= 0, 0.0, rP)
    Ps = (1.0 - rP) * P
    Plq = rP * P

    w = xc @ W.T + b
    gm = jnp.exp(w[:, :nh]) + 1.0
    ge = jax.nn.sigmoid(w[:, nh:2 * nh]) * 2.0
    go = jax.nn.sigmoid(w[:, 2 * nh:3 * nh])
    gl = jnp.exp(w[:, 3 * nh:4 * nh] * 2.0)
    ga = jax.nn.softmax(w[:, 4 * nh:5 * nh], axis=1)
    gb = jax.nn.sigmoid(w[:, 5 * nh:6 * nh])
    qb = jnp.maximum(w[:, -1], 0.0) / nh
    kb = jax.nn.sigmoid(w[:, 6 * nh:7 * nh]) / 10.0
    gi = jax.nn.sigmoid(w[:, 7 * nh:8 * nh])

    ns = P.shape[1]
    z = jnp.zeros((ns, nh), jnp.float32)

    def step(carry, inp):
        S0, H0, G0 = carry
        Psk, Plk, Ek, Tak = inp
        S = S0 + Psk[:, None]
        Sm = jnp.minimum(S0, jnp.maximum(Tak[:, None] * gm, 0.0))
        H = jnp.maximum(H0 + Sm + Plk[:, None] * gi - Ek[:, None] * ge, 0.0)
        Q1 = jnp.maximum(H - gl, 0.0)
        Q2a = jnp.minimum(H, gl) * go
        Q2 = Q2a * (1.0 - gb)
        G = G0 + Q2a * gb
        Q3 = G * kb
        Y = jnp.sum((Q1 + Q2 + Q3 + qb[:, None]) * ga, axis=1)
        return (S - Sm, jnp.minimum(H - Q2a, gl), G - Q3), Y

    _, Ys = jax.lax.scan(step, (z, z, z), (Ps, Plq, E, Ta))
    return Ys


# ----------------------------------------------------------------------------
if __name__ == "__main__":
    nh, ng = 32, 8          # hidden units, static attributes
    nt, ns = 300, 200       # time steps, sites (exercises padding + 2 time blocks)

    key = jax.random.PRNGKey(0)
    k1, k2, k3, k4, k5, k6 = jax.random.split(key, 6)

    # forcings: P, E >= 0; T1 < T2 (so rP is well defined)
    P = jnp.maximum(jax.random.normal(k1, (nt, ns)), 0.0) * 5.0
    E = jnp.maximum(jax.random.normal(k2, (nt, ns)), 0.0) * 2.0
    Tm = jax.random.normal(k3, (nt, ns)) * 10.0
    T1 = Tm - 5.0
    T2 = Tm + 5.0
    x = jnp.stack([P, E, T1, T2], axis=-1).astype(jnp.float32)   # (nt, ns, 4)
    xc = jax.random.normal(k4, (ns, ng), dtype=jnp.float32)      # (ns, ng)

    # parameter init matching reset_parameters(): U(-1/sqrt(nh), 1/sqrt(nh))
    std = 1.0 / math.sqrt(nh)
    W = jax.random.uniform(k5, (nh * 8 + 2, ng), minval=-std, maxval=std,
                           dtype=jnp.float32)                    # fc.weight
    b = jax.random.uniform(k6, (nh * 8 + 2,), minval=-std, maxval=std,
                           dtype=jnp.float32)                    # fc.bias
    # note: the module's extra Parameter `self.w` is unused in forward()

    y_kernel = jax.block_until_ready(waternet2_forward(x, xc, W, b, nh))
    y_ref = jax.block_until_ready(waternet2_ref(x, xc, W, b, nh))

    assert y_kernel.shape == (nt, ns)
    err = float(jnp.max(jnp.abs(y_kernel - y_ref)))
    assert jnp.allclose(y_kernel, y_ref, rtol=2e-4, atol=2e-4), err
    print("KERNEL_OK")
</pallas_src>

<mosaic_0001>
module attributes {stable_mosaic.version = 11 : i64} {
  func.func @waternet2_kernel(%arg0: i32, %arg1: i32, %arg2: memref<256x128xf32, #tpu.memory_space<vmem>>, %arg3: memref<1x128xf32, #tpu.memory_space<vmem>>, %arg4: memref<256x4x128xf32, #tpu.memory_space<vmem>>, %arg5: memref<256x128xf32, #tpu.memory_space<vmem>>, %arg6: memref<32x128xf32, #tpu.memory_space<vmem>>, %arg7: memref<32x128xf32, #tpu.memory_space<vmem>>, %arg8: memref<32x128xf32, #tpu.memory_space<vmem>>) attributes {dimension_semantics = [#tpu.dimension_semantics<parallel>, #tpu.dimension_semantics<arbitrary>], iteration_bounds = array<i64: 2, 2>, scalar_prefetch = 0 : i64, scratch_operands = 3 : i64, tpu.core_type = #tpu.core_type<tc>, window_params = [{transform_indices = @transform_0, window_bounds = array<i64: 256, 128>}, {transform_indices = @transform_1, window_bounds = array<i64: 1, 128>}, {transform_indices = @transform_2, window_bounds = array<i64: 256, 4, 128>}, {transform_indices = @transform_3, window_bounds = array<i64: 256, 128>}]} {
    %c0_i32 = arith.constant 0 : i32
    %0 = arith.cmpi eq, %arg1, %c0_i32 : i32
    %1 = arith.extui %0 : i1 to i32
    %c0_i32_0 = arith.constant 0 : i32
    %2 = arith.cmpi ne, %1, %c0_i32_0 : i32
    scf.if %2 {
      %cst = arith.constant 0.000000e+00 : f32
      %17 = vector.broadcast %cst : f32 to vector<32x128xf32>
      %c0_21 = arith.constant 0 : index
      %c0_22 = arith.constant 0 : index
      %18 = vector.load %arg6[%c0_21, %c0_22] : memref<32x128xf32, #tpu.memory_space<vmem>>, vector<32x128xf32>
      tpu.vector_store %arg6[%c0_21, %c0_22], %17 {strides = array<i32>} : memref<32x128xf32, #tpu.memory_space<vmem>>, vector<32x128xf32>,
      %cst_23 = arith.constant 0.000000e+00 : f32
      %19 = vector.broadcast %cst_23 : f32 to vector<32x128xf32>
      %c0_24 = arith.constant 0 : index
      %c0_25 = arith.constant 0 : index
      %20 = vector.load %arg7[%c0_24, %c0_25] : memref<32x128xf32, #tpu.memory_space<vmem>>, vector<32x128xf32>
      tpu.vector_store %arg7[%c0_24, %c0_25], %19 {strides = array<i32>} : memref<32x128xf32, #tpu.memory_space<vmem>>, vector<32x128xf32>,
      %cst_26 = arith.constant 0.000000e+00 : f32
      %21 = vector.broadcast %cst_26 : f32 to vector<32x128xf32>
      %c0_27 = arith.constant 0 : index
      %c0_28 = arith.constant 0 : index
      %22 = vector.load %arg8[%c0_27, %c0_28] : memref<32x128xf32, #tpu.memory_space<vmem>>, vector<32x128xf32>
      tpu.vector_store %arg8[%c0_27, %c0_28], %21 {strides = array<i32>} : memref<32x128xf32, #tpu.memory_space<vmem>>, vector<32x128xf32>,
    } else {
    }
    %c64 = arith.constant 64 : index
    %c0 = arith.constant 0 : index
    %3 = vector.load %arg2[%c64, %c0] : memref<256x128xf32, #tpu.memory_space<vmem>>, vector<32x128xf32>
    %c96 = arith.constant 96 : index
    %c0_1 = arith.constant 0 : index
    %4 = vector.load %arg2[%c96, %c0_1] : memref<256x128xf32, #tpu.memory_space<vmem>>, vector<32x128xf32>
    %c128 = arith.constant 128 : index
    %c0_2 = arith.constant 0 : index
    %5 = vector.load %arg2[%c128, %c0_2] : memref<256x128xf32, #tpu.memory_space<vmem>>, vector<32x128xf32>
    %c160 = arith.constant 160 : index
    %c0_3 = arith.constant 0 : index
    %6 = vector.load %arg2[%c160, %c0_3] : memref<256x128xf32, #tpu.memory_space<vmem>>, vector<32x128xf32>
    %c192 = arith.constant 192 : index
    %c0_4 = arith.constant 0 : index
    %7 = vector.load %arg2[%c192, %c0_4] : memref<256x128xf32, #tpu.memory_space<vmem>>, vector<32x128xf32>
    %c0_5 = arith.constant 0 : index
    %c0_6 = arith.constant 0 : index
    %8 = vector.load %arg3[%c0_5, %c0_6] : memref<1x128xf32, #tpu.memory_space<vmem>>, vector<1x128xf32>
    %c0_7 = arith.constant 0 : index
    %c0_8 = arith.constant 0 : index
    %9 = vector.load %arg6[%c0_7, %c0_8] : memref<32x128xf32, #tpu.memory_space<vmem>>, vector<32x128xf32>
    %c0_9 = arith.constant 0 : index
    %c0_10 = arith.constant 0 : index
    %10 = vector.load %arg7[%c0_9, %c0_10] : memref<32x128xf32, #tpu.memory_space<vmem>>, vector<32x128xf32>
    %c0_11 = arith.constant 0 : index
    %c0_12 = arith.constant 0 : index
    %11 = vector.load %arg8[%c0_11, %c0_12] : memref<32x128xf32, #tpu.memory_space<vmem>>, vector<32x128xf32>
    %c0_i32_13 = arith.constant 0 : i32
    %c256_i32 = arith.constant 256 : i32
    %12 = arith.addi %c0_i32_13, %c256_i32 : i32
    %c1_i32 = arith.constant 1 : i32
    %13:3 = scf.for %arg9 = %c0_i32_13 to %12 step %c1_i32 iter_args(%arg10 = %9, %arg11 = %10, %arg12 = %11) -> (vector<32x128xf32>, vector<32x128xf32>, vector<32x128xf32>)  : i32 {
      %17 = arith.index_cast %arg9 : i32 to index
      %c0_21 = arith.constant 0 : index
      %c0_22 = arith.constant 0 : index
      %18 = vector.load %arg4[%17, %c0_21, %c0_22] : memref<256x4x128xf32, #tpu.memory_space<vmem>>, vector<1x4x128xf32>
      %19 = vector.shape_cast %18 : vector<1x4x128xf32> to vector<4x128xf32>
      %20 = vector.extract_strided_slice %19 {offsets = [0, 0], sizes = [1, 128], strides = [1, 1]} : vector<4x128xf32> to vector<1x128xf32>
      %21 = vector.extract_strided_slice %19 {offsets = [1, 0], sizes = [1, 128], strides = [1, 1]} : vector<4x128xf32> to vector<1x128xf32>
      %22 = vector.extract_strided_slice %19 {offsets = [2, 0], sizes = [1, 128], strides = [1, 1]} : vector<4x128xf32> to vector<1x128xf32>
      %23 = vector.extract_strided_slice %19 {offsets = [3, 0], sizes = [1, 128], strides = [1, 1]} : vector<4x128xf32> to vector<1x128xf32>
      %c0_23 = arith.constant 0 : index
      %c0_24 = arith.constant 0 : index
      %24 = vector.load %arg2[%c0_23, %c0_24] : memref<256x128xf32, #tpu.memory_space<vmem>>, vector<32x128xf32>
      %c32 = arith.constant 32 : index
      %c0_25 = arith.constant 0 : index
      %25 = vector.load %arg2[%c32, %c0_25] : memref<256x128xf32, #tpu.memory_space<vmem>>, vector<32x128xf32>
      %c224 = arith.constant 224 : index
      %c0_26 = arith.constant 0 : index
      %26 = vector.load %arg2[%c224, %c0_26] : memref<256x128xf32, #tpu.memory_space<vmem>>, vector<32x128xf32>
      %27 = vector.broadcast %20 : vector<1x128xf32> to vector<32x128xf32>
      %28 = arith.addf %arg10, %27 : vector<32x128xf32>
      %29 = vector.broadcast %23 : vector<1x128xf32> to vector<32x128xf32>
      %30 = arith.mulf %29, %24 : vector<32x128xf32>
      %cst = arith.constant 0.000000e+00 : f32
      %31 = vector.broadcast %cst : f32 to vector<32x128xf32>
      %32 = arith.maximumf %30, %31 : vector<32x128xf32>
      %33 = arith.minimumf %arg10, %32 : vector<32x128xf32>
      %34 = arith.addf %arg11, %33 : vector<32x128xf32>
      %35 = vector.broadcast %21 : vector<1x128xf32> to vector<32x128xf32>
      %36 = arith.mulf %35, %26 : vector<32x128xf32>
      %37 = arith.addf %34, %36 : vector<32x128xf32>
      %38 = vector.broadcast %22 : vector<1x128xf32> to vector<32x128xf32>
      %39 = arith.mulf %38, %25 : vector<32x128xf32>
      %40 = arith.subf %37, %39 : vector<32x128xf32>
      %cst_27 = arith.constant 0.000000e+00 : f32
      %41 = vector.broadcast %cst_27 : f32 to vector<32x128xf32>
      %42 = arith.maximumf %40, %41 : vector<32x128xf32>
      %43 = arith.subf %42, %4 : vector<32x128xf32>
      %cst_28 = arith.constant 0.000000e+00 : f32
      %44 = vector.broadcast %cst_28 : f32 to vector<32x128xf32>
      %45 = arith.maximumf %43, %44 : vector<32x128xf32>
      %46 = arith.minimumf %42, %4 : vector<32x128xf32>
      %47 = arith.mulf %46, %3 : vector<32x128xf32>
      %cst_29 = arith.constant 1.000000e+00 : f32
      %48 = vector.broadcast %cst_29 : f32 to vector<32x128xf32>
      %49 = arith.subf %48, %6 : vector<32x128xf32>
      %50 = arith.mulf %47, %49 : vector<32x128xf32>
      %51 = arith.mulf %47, %6 : vector<32x128xf32>
      %52 = arith.addf %arg12, %51 : vector<32x128xf32>
      %53 = arith.mulf %52, %7 : vector<32x128xf32>
      %54 = arith.addf %45, %50 : vector<32x128xf32>
      %55 = arith.addf %54, %53 : vector<32x128xf32>
      %56 = arith.mulf %55, %5 : vector<32x128xf32>
      %cst_30 = arith.constant dense<0.000000e+00> : vector<128xf32>
      %57 = vector.multi_reduction <add>, %56, %cst_30 [0] : vector<32x128xf32> to vector<128xf32>
      %58 = vector.shape_cast %57 : vector<128xf32> to vector<1x128xf32>
      %59 = arith.addf %58, %8 : vector<1x128xf32>
      %60 = arith.index_cast %arg9 : i32 to index
      %c0_31 = arith.constant 0 : index
      %61 = vector.load %arg5[%60, %c0_31] : memref<256x128xf32, #tpu.memory_space<vmem>>, vector<1x128xf32>
      tpu.vector_store %arg5[%60, %c0_31], %59 {strides = array<i32>} : memref<256x128xf32, #tpu.memory_space<vmem>>, vector<1x128xf32>,
      %62 = arith.subf %28, %33 : vector<32x128xf32>
      %63 = arith.subf %42, %47 : vector<32x128xf32>
      %64 = arith.minimumf %63, %4 : vector<32x128xf32>
      %65 = arith.subf %52, %53 : vector<32x128xf32>
      scf.yield %62, %64, %65 : vector<32x128xf32>, vector<32x128xf32>, vector<32x128xf32>
    }
    %c256_i32_14 = arith.constant 256 : i32
    %c0_15 = arith.constant 0 : index
    %c0_16 = arith.constant 0 : index
    %14 = vector.load %arg6[%c0_15, %c0_16] : memref<32x128xf32, #tpu.memory_space<vmem>>, vector<32x128xf32>
    tpu.vector_store %arg6[%c0_15, %c0_16], %13#0 {strides = array<i32>} : memref<32x128xf32, #tpu.memory_space<vmem>>, vector<32x128xf32>,
    %c0_17 = arith.constant 0 : index
    %c0_18 = arith.constant 0 : index
    %15 = vector.load %arg7[%c0_17, %c0_18] : memref<32x128xf32, #tpu.memory_space<vmem>>, vector<32x128xf32>
    tpu.vector_store %arg7[%c0_17, %c0_18], %13#1 {strides = array<i32>} : memref<32x128xf32, #tpu.memory_space<vmem>>, vector<32x128xf32>,
    %c0_19 = arith.constant 0 : index
    %c0_20 = arith.constant 0 : index
    %16 = vector.load %arg8[%c0_19, %c0_20] : memref<32x128xf32, #tpu.memory_space<vmem>>, vector<32x128xf32>
    tpu.vector_store %arg8[%c0_19, %c0_20], %13#2 {strides = array<i32>} : memref<32x128xf32, #tpu.memory_space<vmem>>, vector<32x128xf32>,
    return
  }
  func.func @transform_0(%arg0: i32, %arg1: i32) -> (i32, i32) {
    %c0_i32 = arith.constant 0 : i32
    %c0_i32_0 = arith.constant 0 : i32
    return %c0_i32, %arg0 : i32, i32
  }
  func.func @transform_1(%arg0: i32, %arg1: i32) -> (i32, i32) {
    %c0_i32 = arith.constant 0 : i32
    %c0_i32_0 = arith.constant 0 : i32
    return %c0_i32, %arg0 : i32, i32
  }
  func.func @transform_2(%arg0: i32, %arg1: i32) -> (i32, i32, i32) {
    %c0_i32 = arith.constant 0 : i32
    %c0_i32_0 = arith.constant 0 : i32
    return %arg1, %c0_i32, %arg0 : i32, i32, i32
  }
  func.func @transform_3(%arg0: i32, %arg1: i32) -> (i32, i32) {
    %c0_i32 = arith.constant 0 : i32
    return %arg1, %arg0 : i32, i32
  }
}

</mosaic_0001>

<bundles_post_ra>
// kernel: tpu_custom_call.1
= control target key start
LH: loop header
LB: loop body
LE: loop exit
PB: predicated region body
PF: predicated region fallthrough
CT: control target
= control target key end

     0   :  { %s1876_s0 = inlined_call_operand.hbm [shape: f32[256,256], index: 0, kind: input, shape index: {}]   ;;  %s1877_s1 = inlined_call_operand.hbm [shape: f32[1,256], index: 1, kind: input, shape index: {}]   ;;  %s1878_s2 = inlined_call_operand.hbm [shape: f32[512,4,256], index: 2, kind: input, shape index: {}]   ;;  %s1879_s3 = inlined_call_operand.hbm [shape: f32[512,256], index: 3, kind: output, shape index: {}]  }
   0x1   :  { %1894 = sst [smem:[#allocation33_spill]] %s1876_s0 }
   0x2   :  { %1895 = sst [smem:[#allocation34_spill]] %s1877_s1 }
   0x3   :  { %1896 = sst [smem:[#allocation35_spill]] %s1879_s3 }
   0x4   :  { %8 = vsyncpa [#allocation6], 0 }
   0x5   :  { %10 = vsyncpa [#allocation6 + $0x1], 0 }
   0x6   :  { %11 = vsyncpa [#allocation9], 0 }
   0x7   :  { %13 = vsyncpa [#allocation9 + $0x1], 0 }
   0x8   :  { %14 = vsyncpa [#allocation7], 0 }
   0x9   :  { %16 = vsyncpa [#allocation7 + $0x1], 0  ;;  %s1302_s12 = smov 0   ;;  %s1304_s13 = smov 0  }
   0xa   :  { %s1306_s14 = smov 0   ;;  %s1308_s15 = smov 0  }
   0xb   :  { %s1310_s16 = smov 0   ;;  %s1312_s17 = smov 0  }
   0xc   :  { %s1314_s18 = smov 0   ;;  %s1316_s19 = smov 0  }
   0xd   :  { %s1318_s20 = smov 0   ;;  %s1320_s21 = smov 0  }
   0xe   :  { %s1322_s22 = smov 0  }
   0xf LB: > { %1897 = sst [smem:[#allocation16_spill]] %s1175_s12  ;;  %s1356_s23 = sadd.s32 4294967295, %s1215_s22   ;;  %s1215_s22 = sphi %s1322_s22, %s22_s22   ;;  %s1211_s21 = sphi %s1320_s21, %s1974_s21   ;;  %s1207_s20 = sphi %s1318_s20, %s1973_s20   ;;  %s1203_s19 = sphi %s1316_s19, %s1972_s19   ;;  %s1199_s18 = sphi %s1314_s18, %s1971_s18   ;;  %s1195_s17 = sphi %s1312_s17, %s1963_s17   ;;  %s1191_s16 = sphi %s1310_s16, %s1970_s16   ;;  %s1187_s15 = sphi %s1308_s15, %s1969_s15   ;;  %s1183_s14 = sphi %s1306_s14, %s1968_s14   ;;  %s1179_s13 = sphi %s1304_s13, %s1967_s13   ;;  %s1175_s12 = sphi %s1302_s12, %s1966_s12  }
  0x10   : > { %1898 = sst [smem:[#allocation17_spill]] %s1195_s17  ;;  %s694_s24 = sadd.s32 4294967294, %s1215_s22  }
  0x11   : > { %1899 = sst [smem:[#allocation18_spill]] %s1203_s19  ;;  %s31_s25 = sadd.s32 1, %s1207_s20 }
  0x12   : > { %1900 = sst [smem:[#allocation19_spill]] %s1215_s22  ;;  %s34_s26 = sadd.s32 1, %s1211_s21 }
  0x13   : > { %p32_p0 = scmp.ge.s32.totalorder %s31_s25, 2  ;;  %s41_s27 = sadd.s32 1, %s1195_s17 }
  0x14   : > { %p48_p1 = scmp.ne.s32.totalorder %s1195_s17, %s1191_s16  ;;  %p49_p2 = scmp.eq.s32.totalorder %s1215_s22, 0 }
  0x15   : > { %s1976_s25 = smov (%p32_p0, %s31_s25), 0  ;;  %s1978_s26 = smov (!%p32_p0, %s34_s26), %s1211_s21 }
  0x16   : > { %1901 = sst [smem:[#allocation20_spill]] %s1976_s25  ;;  %p1370_p3 = por %p49_p2, %p48_p1 }
  0x17   : > { %p54_p4 = scmp.ne.s32.totalorder %s1191_s16, %s1187_s15  ;;  %p36_p5 = scmp.ge.s32.totalorder %s1978_s26, 2 }
  0x18   : > { %p55_p6 = scmp.eq.s32.totalorder %s1356_s23, 0  ;;  %s90_s29 = ssub.s32 %s1207_s20, %s1976_s25 }
  0x19   : > { %s95_s30 = sadd.s32 1, %s1183_s14  ;;  %s1980_s26 = smov (%p36_p5, %s1978_s26), 0 }
  0x1a   : > { %1903 = sst [smem:[#allocation21_spill]] %s1980_s26  ;;  %p1383_p7 = por %p55_p6, %p54_p4 }
  0x1b   : > { %p102_p8 = scmp.ne.s32.totalorder %s1183_s14, %s1179_s13  ;;  %s38_s5 = ssub.s32 %s1211_s21, %s1980_s26 }
  0x1c   : > { %s1904_s4 = scalar_select %p1383_p7, 1, 0 }
  0x1d   : > { %p108_p9 = scmp.ne.s32.totalorder %s1179_s13, %s1175_s12  ;;  %p39_p10 = scmp.eq.s32.totalorder %s38_s5, 0 }
  0x1e   : > { %s92_s6 = sor.u32 %s90_s29, %s38_s5  ;;  %p1395_p12 = por %p102_p8, %p49_p2 }
  0x1f   : > { %p93_p11 = scmp.eq.s32.totalorder %s92_s6, 0  ;;  %p1407_p13 = por %p108_p9, %p55_p6 }
  0x20   : > { %s1400_s8 = scalar_select %p39_p10, %s1195_s17, %s41_s27  }
  0x21   : > { %s1403_s9 = scalar_select %p93_p11, %s1183_s14, %s95_s30  }
  0x22   : > { %1906 = sst [smem:[#allocation22_spill]] %s1400_s8  ;;  %p134_p0 = scmp.eq.s32.totalorder %s1356_s23, 3 }
  0x23   : > { %1907 = sst [smem:[#allocation23_spill]] %s1403_s9  ;;  %p140_p1 = scmp.eq.s32.totalorder %s694_s24, 3 }
  0x24   : > { %s1908_s10 = scalar_select %p1407_p13, 1, 0 }
  0x25   : > { %p1412_p4 = por %p134_p0, %p102_p8  ;;  %p1884_p2 = scmp.lt.s32.totalorder %s1215_s22, 4 }
  0x26   : > { %p1417_p5 = por %p140_p1, %p108_p9  ;;  %s1422_s27 = sand.u32 1, %s1195_s17  }
  0x27   : > { %s1909_s11 = scalar_select %p1412_p4, 1, 0 }
  0x28   : > { %s1911_s15 = scalar_select %p1417_p5, 1, 0 }
  0x29   : > { %1910 = sst [smem:[#allocation24_spill]] %s1909_s11  ;;  %s697_s29 = sshll.u32 %s1422_s27, 8 }
  0x2a   : > { %1912 = sst [smem:[#allocation25_spill]] %s1911_s15  ;;  %p1429_p6 = pnand %p1884_p2, %p1370_p3 }
  0x2b   : > { %s164_s24 = scalar_lea.vmem [#allocation5], %s697_s29  ;;  %s180_s6 = sand.u32 1, %s1215_s22  }
  0x2c   : > { %s170_s5 = sshll.u32 %s164_s24, 4  ;;  %s699_s26 = sshll.u32 %s1211_s21, 4  ;;  %s1434_s5 = int_to_ptr.vmem [resolvable:$true] %s170_s5 }
  0x2d   : > { %s183_s25 = scalar_lea.vmem [#allocation8], %s1422_s27  ;;  %s1914_s1 = sld [smem:[#allocation34_spill]] }
  0x2e   : > { %s190_s8 = sshll.u32 %s183_s25, 4  ;;  %s1445_s28 = scalar_lea.sflag [#allocation9], %s180_s6  ;;  %s1443_s8 = int_to_ptr.vmem [resolvable:$true] %s190_s8 }
  0x2f   : > { %p945_p8 = pneg %p1429_p6 }
  0x33   : > { %s1441_s15 = scalar_lea.hbm %s1914_s1, %s699_s26  ;;  %s948_s26 = scalar_lea.hbm %s1914_s1, 32 }
  0x34   : > { %s943_s29 = scalar_lea.hbm %s1441_s15, 16  ;;  %p949_p11 = scmp.lt.u32.totalorder %s1441_s15, %s1914_s1 }
  0x35   : > { %p944_p3 = scmp.ne.s32.totalorder %s1441_s15, %s943_s29  ;;  %p950_p0 = scmp.lt.u32.totalorder %s948_s26, %s943_s29 }
  0x36   : > { %p952_p2 = scmp.lt.u32.totalorder %s943_s29, %s1441_s15 }
  0x37   : > { %p946_p9 = pnand %p945_p8, %p944_p3  ;;  %p951_p1 = por %p950_p0, %p949_p11 }
  0x39   : > { %p947_p10 = pneg %p946_p9  ;;  %p953_p5 = por %p952_p2, %p951_p1 }
  0x3b   : > { %p954_p4 = pnand %p953_p5, %p947_p10 }
  0x3d   : > { %957 = shalt.err (!%p954_p4)
}
  0x3e   : > { %s958_s6 = scalar_lea.vmem %s1443_s8, 16  ;;  %s1269_s25 = smov [#allocation8]  }
  0x3f   : > { %p959_p3 = scmp.ne.s32.totalorder %s1443_s8, %s958_s6  ;;  %s963_s17 = sshll.u32 %s1269_s25, 4  ;;  %s964_s17 = int_to_ptr.vmem [resolvable:$false] %s963_s17 }
  0x40   : > { %s965_s9 = scalar_lea.vmem %s964_s17, 32  ;;  %p966_p7 = scmp.lt.s32.totalorder %s1443_s8, %s964_s17 }
  0x41   : > { %p961_p9 = pnand %p959_p3, %p945_p8  ;;  %p967_p11 = scmp.lt.s32.totalorder %s965_s9, %s958_s6 }
  0x43   : > { %p962_p13 = pneg %p961_p9  ;;  %p968_p0 = por %p967_p11, %p966_p7 }
  0x45   : > { %p969_p2 = pnand %p968_p0, %p962_p13 }
  0x47   : > { %972 = shalt.err (!%p969_p2)
}
  0x48   : > { %732 = dma.hbm_to_vmem [thread:$0]  (!%p1429_p6), %s1441_s15, 16, %s1443_s8, %s1445_s28  }
  0x49   : > { %p1915_p4 = scmp.lt.s32.totalorder %s1215_s22, 4  ;;  %p704_p7 = scmp.ge.s32.totalorder %s1215_s22, 1 }
  0x4a   : > { %p218_p13 = scmp.lt.s32.totalorder %s1215_s22, 5  ;;  %s698_s24 = sshll.u32 %s1211_s21, 7 }
  0x4b   : > { %p1477_p5 = pnand %p1915_p4, %p1395_p12  ;;  %s1918_s0 = sld [smem:[#allocation33_spill]] }
  0x4c   : > { %p1483_p10 = pnand %p704_p7, %p218_p13  ;;  %s161_s7 = scalar_lea.sflag [#allocation6], %s1422_s27 }
  0x4e   : > { %s1917_s26 = scalar_select %p1483_p10, 1, 0 }
  0x51   : > { %s1491_s17 = scalar_lea.hbm %s1918_s0, %s698_s24  ;;  %s978_s1 = scalar_lea.hbm %s1918_s0, 8192 }
  0x52   : > { %s973_s8 = scalar_lea.hbm %s1491_s17, 4096  ;;  %p979_p9 = scmp.lt.u32.totalorder %s1491_s17, %s1918_s0 }
  0x53   : > { %p974_p12 = scmp.ne.s32.totalorder %s1491_s17, %s973_s8  ;;  %p980_p11 = scmp.lt.u32.totalorder %s978_s1, %s973_s8 }
  0x54   : > { %p982_p2 = scmp.lt.u32.totalorder %s973_s8, %s1491_s17 }
  0x55   : > { %p976_p1 = pnand %p974_p12, %p945_p8  ;;  %p981_p0 = por %p980_p11, %p979_p9 }
  0x57   : > { %p977_p3 = pneg %p976_p1  ;;  %p983_p4 = por %p982_p2, %p981_p0 }
  0x59   : > { %p984_p7 = pnand %p983_p4, %p977_p3 }
  0x5b   : > { %987 = shalt.err (!%p984_p7)
}
  0x5c   : > { %s988_s24 = scalar_lea.vmem %s1434_s5, 4096  ;;  %s1270_s6 = smov [#allocation5]  }
  0x5d   : > { %p989_p13 = scmp.ne.s32.totalorder %s1434_s5, %s988_s24  ;;  %s993_s25 = sshll.u32 %s1270_s6, 4  ;;  %s994_s25 = int_to_ptr.vmem [resolvable:$false] %s993_s25 }
  0x5e   : > { %s995_s12 = scalar_lea.vmem %s994_s25, 8192  ;;  %p996_p10 = scmp.lt.s32.totalorder %s1434_s5, %s994_s25 }
  0x5f   : > { %p991_p12 = pnand %p989_p13, %p945_p8  ;;  %p997_p9 = scmp.lt.s32.totalorder %s995_s12, %s988_s24 }
  0x61   : > { %p992_p1 = pneg %p991_p12  ;;  %p998_p11 = por %p997_p9, %p996_p10 }
  0x63   : > { %p999_p0 = pnand %p998_p11, %p992_p1 }
  0x65   : > { %1002 = shalt.err (!%p999_p0)
}
  0x66   : > { %s1271_s1 = smov 256   ;;  %s1272_s22 = smov 128  }
  0x67   : > { %s1273_s8 = smov 8   ;;  %s199_s15 = sand.u32 1, %s1183_s14  }
  0x68   : > { %729 = dma.hbm_to_vmem [thread:$0]  (!%p1429_p6), %s1491_s17, 4096, %s1434_s5, %s161_s7, %s1271_s1, %s1272_s22, %s1273_s8  }
  0x69   : > { %s716_s9 = sshll.u32 %s1207_s20, 9  ;;  %s700_s24 = sshll.u32 %s199_s15, 10 }
  0x6a   : > { %s207_s6 = sadd.s32 %s1211_s21, %s716_s9  ;;  %s201_s11 = scalar_lea.vmem [#allocation10], %s700_s24 }
  0x6b   : > { %s703_s25 = sshll.u32 %s207_s6, 6  ;;  %s210_s19 = sshll.u32 %s201_s11, 4  ;;  %s1528_s19 = int_to_ptr.vmem [resolvable:$true] %s210_s19 }
  0x6c   : > { %s1526_s3 = scalar_lea.hbm %s1878_s2, %s703_s25  ;;  %p1005_p8 = pneg %p1477_p5 }
  0x6d   : > { %s1003_s27 = scalar_lea.hbm %s1526_s3, 16384  ;;  %s1008_s5 = scalar_lea.hbm %s1878_s2, 65536 }
  0x6e   : > { %p1004_p6 = scmp.ne.s32.totalorder %s1526_s3, %s1003_s27  ;;  %p1009_p2 = scmp.lt.u32.totalorder %s1526_s3, %s1878_s2 }
  0x6f   : > { %p1010_p4 = scmp.lt.u32.totalorder %s1008_s5, %s1003_s27  ;;  %p1012_p13 = scmp.lt.u32.totalorder %s1003_s27, %s1526_s3 }
  0x70   : > { %p1006_p10 = pnand %p1005_p8, %p1004_p6 }
  0x71   : > { %p1011_p7 = por %p1010_p4, %p1009_p2 }
  0x72   : > { %p1007_p3 = pneg %p1006_p10 }
  0x73   : > { %p1013_p12 = por %p1012_p13, %p1011_p7 }
  0x75   : > { %p1014_p1 = pnand %p1013_p12, %p1007_p3 }
  0x77   : > { %1017 = shalt.err (!%p1014_p1)
}
  0x78   : > { %s1018_s11 = scalar_lea.vmem %s1528_s19, 16384  ;;  %s1274_s1 = smov [#allocation10]  }
  0x79   : > { %p1019_p9 = scmp.ne.s32.totalorder %s1528_s19, %s1018_s11  ;;  %s1023_s8 = sshll.u32 %s1274_s1, 4  ;;  %s1024_s8 = int_to_ptr.vmem [resolvable:$false] %s1023_s8 }
  0x7a   : > { %s1025_s15 = scalar_lea.vmem %s1024_s8, 32768  ;;  %p1026_p6 = scmp.lt.s32.totalorder %s1528_s19, %s1024_s8 }
  0x7b   : > { %p1021_p11 = pnand %p1019_p9, %p1005_p8  ;;  %p1027_p10 = scmp.lt.s32.totalorder %s1025_s15, %s1018_s11 }
  0x7d   : > { %p1022_p0 = pneg %p1021_p11  ;;  %p1028_p2 = por %p1027_p10, %p1026_p6 }
  0x7f   : > { %p1029_p4 = pnand %p1028_p2, %p1022_p0 }
  0x81   : > { %1032 = shalt.err (!%p1029_p4)
}
  0x82   : > { %s1275_s9 = smov 64   ;;  %s1276_s24 = smov 4  }
  0x83   : > { %735 = dma.hbm_to_vmem [thread:$0]  (!%p1477_p5), %s1526_s3, 16384, %s1528_s19, %s1445_s28, %s1272_s22, %s1275_s9, %s1276_s24  }
  0x84   : > { %p1919_p8 = scmp.ne.s32.totalorder %s1917_s26, 0 }
  0x86   : > { %222 = sbr.rel (%p1919_p8) target bundleno = 247 (0xf7), region = 32 }
  0x8d   : > { %s1560_s6 = sand.u32 1, %s1191_s16   ;;  %p1920_p3 = scmp.ne.s32.totalorder %s1904_s4, 0 }
  0x8e   : > { %s705_s25 = sshll.u32 %s1560_s6, 8  ;;  %s225_s12 = scalar_lea.sflag [#allocation6], %s1560_s6 }
  0x8f   : > { %s1564_s27 = scalar_lea.vmem [#allocation5], %s705_s25 }
  0x90   : > { %1158 = dma.done.wait (%p1920_p3), %s225_s12, 4096  }
  0x91   : > { %1160 = vsyncadd (%p1920_p3), %s225_s12, 4294963200  ;;  %s233_s3 = sand.u32 1, %s1356_s23   ;;  %s236_s28 = scalar_lea.vmem [#allocation8], %s1560_s6 }
  0x92   : > { %s234_s19 = scalar_lea.sflag [#allocation9], %s233_s3 }
  0x93   : > { %1162 = dma.done.wait (%p1920_p3), %s234_s19, 16  }
  0x94   : > { %1164 = vsyncadd (%p1920_p3), %s234_s19, 4294967280  ;;  %s1577_s29 = sand.u32 1, %s1179_s13   ;;  %p1921_p5 = scmp.ne.s32.totalorder %s1908_s10, 0 }
  0x95   : > { %s706_s26 = sshll.u32 %s1577_s29, 10 }
  0x96   : > { %s1580_s22 = scalar_lea.vmem [#allocation10], %s706_s26 }
  0x97   : > { %1166 = dma.done.wait (%p1921_p5), %s234_s19, 16384  }
  0x98   : > { %1168 = vsyncadd (%p1921_p5), %s234_s19, 4294950912  ;;  %s707_s23 = sshll.u32 %s1577_s29, 8  ;;  %p708_p7 = scmp.ne.s32.totalorder %s1199_s18, 0 }
  0x99   : > { %s1587_s30 = scalar_lea.vmem [#allocation11], %s707_s23  ;;  %v1277_v0 = vmov (!%p708_p7), 0.0  }
  0x9a   : > { %282 = sbr.rel (%p708_p7) target bundleno = 161 (0xa1), region = 48  ;;  %283 = vst [vmem:[#allocation2] sm:$0xff] (!%p708_p7), %v1277_v0  ;;  %284 = vst [vmem:[#allocation2 + $0x8] sm:$0xff] (!%p708_p7), %v1277_v0 }
  0x9b   : > { %285 = vst [vmem:[#allocation2 + $0x10] sm:$0xff] (!%p708_p7), %v1277_v0  ;;  %286 = vst [vmem:[#allocation2 + $0x18] sm:$0xff] (!%p708_p7), %v1277_v0 }
  0x9c   : > { %287 = vst [vmem:[#allocation3] sm:$0xff] (!%p708_p7), %v1277_v0  ;;  %288 = vst [vmem:[#allocation3 + $0x8] sm:$0xff] (!%p708_p7), %v1277_v0 }
  0x9d   : > { %289 = vst [vmem:[#allocation3 + $0x10] sm:$0xff] (!%p708_p7), %v1277_v0  ;;  %290 = vst [vmem:[#allocation3 + $0x18] sm:$0xff] (!%p708_p7), %v1277_v0 }
  0x9e   : > { %291 = vst [vmem:[#allocation4] sm:$0xff] (!%p708_p7), %v1277_v0  ;;  %292 = vst [vmem:[#allocation4 + $0x8] sm:$0xff] (!%p708_p7), %v1277_v0 }
  0x9f   : > { %293 = vst [vmem:[#allocation4 + $0x10] sm:$0xff] (!%p708_p7), %v1277_v0  ;;  %294 = vst [vmem:[#allocation4 + $0x18] sm:$0xff] (!%p708_p7), %v1277_v0 }
  0xa1 PF: > { %v1591_v1 = vld [vmem:[%s1564_s27 + $0x40] sm:$0xff]  ;;  %v1594_v2 = vld [vmem:[%s1564_s27 + $0x48] sm:$0xff]  ;;  %v1597_v3 = vld [vmem:[%s1564_s27 + $0x50] sm:$0xff]  ;;  %s1678_s4 = smov 0  }
  0xa2   : > { %v1600_v4 = vld [vmem:[%s1564_s27 + $0x58] sm:$0xff]  ;;  %v1603_v5 = vld [vmem:[%s1564_s27 + $0x60] sm:$0xff]  ;;  %v1606_v6 = vld [vmem:[%s1564_s27 + $0x68] sm:$0xff] }
  0xa3   : > { %v1609_v7 = vld [vmem:[%s1564_s27 + $0x70] sm:$0xff]  ;;  %v1612_v8 = vld [vmem:[%s1564_s27 + $0x78] sm:$0xff]  ;;  %v1615_v9 = vld [vmem:[%s1564_s27 + $0x80] sm:$0xff] }
  0xa4   : > { %1922 = vst [vmem:[#allocation26_spill] sm:$0xff] %v1615_v9  ;;  %v1618_v10 = vld [vmem:[%s1564_s27 + $0x88] sm:$0xff]  ;;  %v1621_v11 = vld [vmem:[%s1564_s27 + $0x90] sm:$0xff]  ;;  %v1624_v12 = vld [vmem:[%s1564_s27 + $0x98] sm:$0xff] }
  0xa5   : > { %1923 = vst [vmem:[#allocation27_spill] sm:$0xff] %v1618_v10  ;;  %1924 = vst [vmem:[#allocation28_spill] sm:$0xff] %v1621_v11  ;;  %v1627_v13 = vld [vmem:[%s1564_s27 + $0xa0] sm:$0xff]  ;;  %v1630_v14 = vld [vmem:[%s1564_s27 + $0xa8] sm:$0xff] }
  0xa6   : > { %1925 = vst [vmem:[#allocation29_spill] sm:$0xff] %v1624_v12  ;;  %v1633_v15 = vld [vmem:[%s1564_s27 + $0xb0] sm:$0xff]  ;;  %v1636_v16 = vld [vmem:[%s1564_s27 + $0xb8] sm:$0xff]  ;;  %v1639_v17 = vld [vmem:[%s1564_s27 + $0xc0] sm:$0xff] }
  0xa7   : > { %v1642_v18 = vld [vmem:[%s1564_s27 + $0xc8] sm:$0xff]  ;;  %v1645_v19 = vld [vmem:[%s1564_s27 + $0xd0] sm:$0xff]  ;;  %v1648_v20 = vld [vmem:[%s1564_s27 + $0xd8] sm:$0xff] }
  0xa8   : > { %1926 = vst [vmem:[#allocation30_spill] sm:$0xff] %v1645_v19  ;;  %1927 = vst [vmem:[#allocation31_spill] sm:$0xff] %v1648_v20  ;;  %v1652_v21 = vld [vmem:[%s236_s28] sm:$0x1]  ;;  %v317_v23 = vld [vmem:[#allocation2 + $0x8] sm:$0xff]  }
  0xa9   : > { %1928 = vst [vmem:[#allocation32_spill] sm:$0xff] %v1652_v21  ;;  %v316_v22 = vld [vmem:[#allocation2] sm:$0xff]   ;;  %v318_v24 = vld [vmem:[#allocation2 + $0x10] sm:$0xff]   ;;  %v319_v25 = vld [vmem:[#allocation2 + $0x18] sm:$0xff]  }
  0xaa   : > { %v320_v26 = vld [vmem:[#allocation3] sm:$0xff]   ;;  %v321_v27 = vld [vmem:[#allocation3 + $0x8] sm:$0xff]   ;;  %v322_v28 = vld [vmem:[#allocation3 + $0x10] sm:$0xff]  }
  0xab   : > { %v323_v29 = vld [vmem:[#allocation3 + $0x18] sm:$0xff]   ;;  %v324_v30 = vld [vmem:[#allocation4] sm:$0xff]   ;;  %v325_v31 = vld [vmem:[#allocation4 + $0x8] sm:$0xff]  }
  0xac   : > { %v326_v32 = vld [vmem:[#allocation4 + $0x10] sm:$0xff]   ;;  %v327_v33 = vld [vmem:[#allocation4 + $0x18] sm:$0xff]  }
  0xad LB: >> { %s709_s10 = sshll.u32 %s1267_s4, 2  ;;  %v361_v34 = vlaneseq  ;;  %v349_v41 = vld [vmem:[%s1564_s27] sm:$0xff]  ;;  %v350_v42 = vld [vmem:[%s1564_s27 + $0x8] sm:$0xff]  ;;  %v351_v43 = vld [vmem:[%s1564_s27 + $0x10] sm:$0xff]  ;;  %s475_s5 = scalar_lea.vmem %s1587_s30, %s1267_s4 [#allocation11]  ;;  %s1267_s4 = sphi %s1678_s4, %s333_s4   ;;  %v1263_v22 = vphi %v316_v22, %v1952_v22   ;;  %v1259_v23 = vphi %v317_v23, %v1951_v23   ;;  %v1255_v24 = vphi %v318_v24, %v1950_v24   ;;  %v1251_v25 = vphi %v319_v25, %v1949_v25   ;;  %v1247_v26 = vphi %v320_v26, %v1948_v26   ;;  %v1243_v27 = vphi %v321_v27, %v1947_v27   ;;  %v1239_v28 = vphi %v322_v28, %v1946_v28   ;;  %v1235_v29 = vphi %v323_v29, %v1945_v29   ;;  %v1231_v30 = vphi %v324_v30, %v1944_v30   ;;  %v1227_v31 = vphi %v325_v31, %v1943_v31   ;;  %v1223_v32 = vphi %v326_v32, %v1942_v32   ;;  %v1219_v33 = vphi %v327_v33, %v1941_v33  }
  0xae   : >> { %s347_s0 = scalar_lea.vmem %s1580_s22, %s709_s10 [#allocation10]  ;;  %v352_v44 = vld [vmem:[%s1564_s27 + $0x18] sm:$0xff]  ;;  %v357_v47 = vld [vmem:[%s1564_s27 + $0xe0] sm:$0xff]  ;;  %v358_v50 = vld [vmem:[%s1564_s27 + $0xe8] sm:$0xff]  ;;  %s333_s4 = sadd.s32 1, %s1267_s4  }
  0xaf   : >> { %v362_v35 = vshrl.u32 %v361_v34, 7  ;;  %v348_v36 = vld [vmem:[%s347_s0] sm:$0xf]  ;;  %v359_v51 = vld [vmem:[%s1564_s27 + $0xf0] sm:$0xff]  ;;  %v360_v52 = vld [vmem:[%s1564_s27 + $0xf8] sm:$0xff]  ;;  %p1765_p13 = scmp.ge.s32.totalorder %s333_s4, 256  }
  0xb0   : >> { %v353_v57 = vld [vmem:[%s1564_s27 + $0x20] sm:$0xff]  ;;  %v354_v58 = vld [vmem:[%s1564_s27 + $0x28] sm:$0xff]  ;;  %v355_v63 = vld [vmem:[%s1564_s27 + $0x30] sm:$0xff]  ;;  %s1953_s7 = sld [smem:[#allocation18_spill]] (%p1765_p13)  ;;  %s1954_s11 = sld [smem:[#allocation24_spill]] (%p1765_p13) }
  0xb1   : >> { %v363_v37 = vsub.s32 0, %v362_v35  ;;  %v371_v38 = vsub.s32 3, %v362_v35  ;;  %v391_v39 = vsub.s32 1, %v362_v35  ;;  %v403_v40 = vsub.s32 2, %v362_v35  ;;  %v356_v0 = vld [vmem:[%s1564_s27 + $0x38] sm:$0xff]  ;;  %s717_s1 = sshll.u32 (%p1765_p13), %s1199_s18, 6 }
  0xb2   : > { %s521_s15 = sshll.u32 (%p1765_p13), %s1587_s30, 4  ;;  %s1955_s25 = sld [smem:[#allocation35_spill]] (%p1765_p13)  ;;  %s1808_s15 = int_to_ptr.vmem [resolvable:$true] %s521_s15 }
  0xb3   : >> { %v364_v45 = vrot.slane %v348_v36, %v363_v37  ;;  %v372_v46 = vrot.slane %v348_v36, %v371_v38  ;;  %v392_v48 = vrot.slane %v348_v36, %v391_v39  ;;  %v404_v49 = vrot.slane %v348_v36, %v403_v40  ;;  %s506_s27 = scalar_lea.sflag (%p1765_p13), [#allocation7], %s1577_s29  ;;  %s1033_s3 = scalar_lea.vmem (%p1765_p13), %s1808_s15, 4096 }
  0xb4   : > { %p1034_p12 = scmp.ne.s32.totalorder (%p1765_p13), %s1808_s15, %s1033_s3  ;;  %s1278_s18 = smov (%p1765_p13), [#allocation11]  }
  0xb5   : >> { %v373_v53 = vmul.f32 %v372_v46, %v349_v41  ;;  %v374_v54 = vmul.f32 %v372_v46, %v350_v42  ;;  %v375_v55 = vmul.f32 %v372_v46, %v351_v43  ;;  %v376_v56 = vmul.f32 %v372_v46, %v352_v44  ;;  %s1037_s19 = sshll.u32 (%p1765_p13), %s1278_s18, 4  ;;  %s1038_s19 = int_to_ptr.vmem [resolvable:$false] %s1037_s19 }
  0xb6   : >> { %v365_v59 = vadd.f32 %v1263_v22, %v364_v45  ;;  %v366_v60 = vadd.f32 %v1259_v23, %v364_v45  ;;  %v367_v61 = vadd.f32 %v1255_v24, %v364_v45  ;;  %v368_v62 = vadd.f32 %v1251_v25, %v364_v45  ;;  %s518_s8 = sadd.s32 (%p1765_p13), %s1953_s7, %s717_s1  ;;  %p1956_p1 = scmp.ne.s32.totalorder (%p1765_p13), %s1954_s11, 0 }
  0xb7   : >> { %v377_v34 = vmax.f32 %v373_v53, 0.0  ;;  %v378_v35 = vmax.f32 %v374_v54, 0.0  ;;  %v379_v37 = vmax.f32 %v375_v55, 0.0  ;;  %v380_v38 = vmax.f32 %v376_v56, 0.0  ;;  %s713_s9 = sshll.u32 (%p1765_p13), %s518_s8, 7  ;;  %s1039_s28 = scalar_lea.vmem (%p1765_p13), %s1038_s19, 8192 }
  0xb8   : >> { %v393_v36 = vmul.f32 %v392_v48, %v357_v47  ;;  %v394_v39 = vmul.f32 %v392_v48, %v358_v50  ;;  %v395_v40 = vmul.f32 %v392_v48, %v359_v51  ;;  %v396_v21 = vmul.f32 %v392_v48, %v360_v52  ;;  %s1813_s12 = scalar_lea.hbm (%p1765_p13), %s1955_s25, %s713_s9  ;;  %p1035_p9 = pnand (%p1765_p13), %p1034_p12, %p1956_p1 }
  0xb9   : >> { %v381_v41 = vmin.f32 %v1263_v22, %v377_v34  ;;  %v382_v42 = vmin.f32 %v1259_v23, %v378_v35  ;;  %v383_v43 = vmin.f32 %v1255_v24, %v379_v37  ;;  %v384_v44 = vmin.f32 %v1251_v25, %v380_v38  ;;  %p1040_p0 = scmp.lt.s32.totalorder (%p1765_p13), %s1808_s15, %s1038_s19  ;;  %p1041_p6 = scmp.lt.s32.totalorder (%p1765_p13), %s1039_s28, %s1033_s3 }
  0xba   : >> { %v405_v46 = vmul.f32 %v404_v49, %v353_v57  ;;  %v406_v12 = vmul.f32 %v404_v49, %v354_v58  ;;  %v407_v11 = vmul.f32 %v404_v49, %v355_v63  ;;  %v408_v10 = vmul.f32 %v404_v49, %v356_v0  ;;  %p1036_p11 = pneg (%p1765_p13), %p1035_p9 }
  0xbb   : >> { %v385_v9 = vadd.f32 %v1247_v26, %v381_v41  ;;  %v386_v45 = vadd.f32 %v1243_v27, %v382_v42  ;;  %v387_v20 = vadd.f32 %v1239_v28, %v383_v43  ;;  %v388_v19 = vadd.f32 %v1235_v29, %v384_v44  ;;  %p1042_p10 = por (%p1765_p13), %p1041_p6, %p1040_p0 }
  0xbc   : >> { %v1717_v22 = vsub.f32 %v365_v59, %v381_v41   ;;  %v1719_v23 = vsub.f32 %v366_v60, %v382_v42   ;;  %v1721_v24 = vsub.f32 %v367_v61, %v383_v43   ;;  %v1723_v25 = vsub.f32 %v368_v62, %v384_v44  }
  0xbd   : >> { %v397_v50 = vadd.f32 %v393_v36, %v385_v9  ;;  %v398_v51 = vadd.f32 %v394_v39, %v386_v45  ;;  %v399_v52 = vadd.f32 %v395_v40, %v387_v20  ;;  %v400_v55 = vadd.f32 %v396_v21, %v388_v19  ;;  %p1043_p2 = pnand (%p1765_p13), %p1042_p10, %p1036_p11 }
  0xbe   : >> { %v1929_v53 = vmov %v1717_v22  ;;  %v1930_v54 = vmov %v1719_v23  ;;  %v1931_v47 = vmov %v1721_v24  ;;  %v1932_v48 = vmov %v1723_v25 }
  0xbf   : >> { %v409_v56 = vsub.f32 %v397_v50, %v405_v46  ;;  %v410_v57 = vsub.f32 %v398_v51, %v406_v12  ;;  %v411_v58 = vsub.f32 %v399_v52, %v407_v11  ;;  %v412_v49 = vsub.f32 %v400_v55, %v408_v10  ;;  %493 = vst [vmem:[#allocation2] sm:$0xff] (%p1765_p13), %v1929_v53 }
  0xc0   : >> { %v433_v22 = vsub.f32 1.0, %v1627_v13  ;;  %v434_v23 = vsub.f32 1.0, %v1630_v14  ;;  %v435_v24 = vsub.f32 1.0, %v1633_v15  ;;  %v436_v25 = vsub.f32 1.0, %v1636_v16  ;;  %494 = vst [vmem:[#allocation2 + $0x8] sm:$0xff] (%p1765_p13), %v1930_v54  ;;  %495 = vst [vmem:[#allocation2 + $0x10] sm:$0xff] (%p1765_p13), %v1931_v47 }
  0xc1   : >> { %v413_v26 = vmax.f32 %v409_v56, 0.0  ;;  %v414_v27 = vmax.f32 %v410_v57, 0.0  ;;  %v415_v28 = vmax.f32 %v411_v58, 0.0  ;;  %v416_v29 = vmax.f32 %v412_v49, 0.0  ;;  %496 = vst [vmem:[#allocation2 + $0x18] sm:$0xff] (%p1765_p13), %v1932_v48 }
  0xc3   : >> { %v417_v9 = vsub.f32 %v413_v26, %v1603_v5  ;;  %v418_v19 = vsub.f32 %v414_v27, %v1606_v6  ;;  %v419_v12 = vsub.f32 %v415_v28, %v1609_v7  ;;  %v420_v10 = vsub.f32 %v416_v29, %v1612_v8 }
  0xc4   : >> { %v425_v11 = vmin.f32 %v413_v26, %v1603_v5  ;;  %v426_v20 = vmin.f32 %v414_v27, %v1606_v6  ;;  %v427_v21 = vmin.f32 %v415_v28, %v1609_v7  ;;  %v428_v59 = vmin.f32 %v416_v29, %v1612_v8 }
  0xc5   : >> { %v421_v60 = vmax.f32 %v417_v9, 0.0  ;;  %v422_v61 = vmax.f32 %v418_v19, 0.0  ;;  %v423_v62 = vmax.f32 %v419_v12, 0.0  ;;  %v424_v63 = vmax.f32 %v420_v10, 0.0  ;;  %v1933_v9 = vld [vmem:[#allocation30_spill] sm:$0xff]  ;;  %v1934_v12 = vld [vmem:[#allocation31_spill] sm:$0xff] }
  0xc6   : >> { %v429_v0 = vmul.f32 %v425_v11, %v1591_v1  ;;  %v430_v34 = vmul.f32 %v426_v20, %v1594_v2  ;;  %v431_v35 = vmul.f32 %v427_v21, %v1597_v3  ;;  %v432_v37 = vmul.f32 %v428_v59, %v1600_v4 }
  0xc8   : >> { %v437_v38 = vmul.f32 %v433_v22, %v429_v0  ;;  %v438_v36 = vmul.f32 %v434_v23, %v430_v34  ;;  %v439_v39 = vmul.f32 %v435_v24, %v431_v35  ;;  %v440_v40 = vmul.f32 %v436_v25, %v432_v37 }
  0xc9   : >> { %v441_v41 = vmul.f32 %v429_v0, %v1627_v13  ;;  %v442_v42 = vmul.f32 %v430_v34, %v1630_v14  ;;  %v443_v43 = vmul.f32 %v431_v35, %v1633_v15  ;;  %v444_v44 = vmul.f32 %v432_v37, %v1636_v16 }
  0xca   : >> { %v453_v46 = vadd.f32 %v437_v38, %v421_v60  ;;  %v454_v45 = vadd.f32 %v438_v36, %v422_v61  ;;  %v455_v50 = vadd.f32 %v439_v39, %v423_v62  ;;  %v456_v51 = vadd.f32 %v440_v40, %v424_v63 }
  0xcb   : >> { %v445_v52 = vadd.f32 %v1231_v30, %v441_v41  ;;  %v446_v55 = vadd.f32 %v1227_v31, %v442_v42  ;;  %v447_v56 = vadd.f32 %v1223_v32, %v443_v43  ;;  %v448_v57 = vadd.f32 %v1219_v33, %v444_v44 }
  0xcc   : >> { %v481_v58 = vsub.f32 %v413_v26, %v429_v0  ;;  %v482_v49 = vsub.f32 %v414_v27, %v430_v34  ;;  %v483_v22 = vsub.f32 %v415_v28, %v431_v35  ;;  %v484_v23 = vsub.f32 %v416_v29, %v432_v37  ;;  %v1935_v26 = vld [vmem:[#allocation26_spill] sm:$0xff]  ;;  %v1936_v28 = vld [vmem:[#allocation27_spill] sm:$0xff]  ;;  %v1937_v0 = vld [vmem:[#allocation28_spill] sm:$0xff] }
  0xcd   : >> { %v449_v24 = vmul.f32 %v445_v52, %v1639_v17  ;;  %v450_v25 = vmul.f32 %v446_v55, %v1642_v18  ;;  %v451_v19 = vmul.f32 %v447_v56, %v1933_v9  ;;  %v452_v10 = vmul.f32 %v448_v57, %v1934_v12  ;;  %v1938_v35 = vld [vmem:[#allocation29_spill] sm:$0xff] }
  0xce   : >> { %v485_v11 = vmin.f32 %v481_v58, %v1603_v5   ;;  %v486_v20 = vmin.f32 %v482_v49, %v1606_v6   ;;  %v487_v21 = vmin.f32 %v483_v22, %v1609_v7   ;;  %v488_v59 = vmin.f32 %v484_v23, %v1612_v8  }
  0xcf   : >> { %v457_v30 = vadd.f32 %v453_v46, %v449_v24  ;;  %v458_v31 = vadd.f32 %v454_v45, %v450_v25  ;;  %v459_v32 = vadd.f32 %v455_v50, %v451_v19  ;;  %v460_v33 = vadd.f32 %v456_v51, %v452_v10  ;;  %v1939_v45 = vld [vmem:[#allocation32_spill] sm:$0xff] }
  0xd0   : >> { %v489_v60 = vsub.f32 %v445_v52, %v449_v24   ;;  %v490_v61 = vsub.f32 %v446_v55, %v450_v25   ;;  %v491_v62 = vsub.f32 %v447_v56, %v451_v19   ;;  %v492_v63 = vsub.f32 %v448_v57, %v452_v10   ;;  %497 = vst [vmem:[#allocation3] sm:$0xff] (%p1765_p13), %v485_v11 }
  0xd1   : >> { %v461_v27 = vmul.f32 %v457_v30, %v1935_v26  ;;  %v462_v29 = vmul.f32 %v458_v31, %v1936_v28  ;;  %v463_v34 = vmul.f32 %v459_v32, %v1937_v0  ;;  %v464_v37 = vmul.f32 %v460_v33, %v1938_v35  ;;  %498 = vst [vmem:[#allocation3 + $0x8] sm:$0xff] (%p1765_p13), %v486_v20 }
  0xd2   : >> { %v1941_v33 = vmov %v492_v63  ;;  %v1942_v32 = vmov %v491_v62  ;;  %v1943_v31 = vmov %v490_v61  ;;  %v1944_v30 = vmov %v489_v60  ;;  %499 = vst [vmem:[#allocation3 + $0x10] sm:$0xff] (%p1765_p13), %v487_v21  ;;  %500 = vst [vmem:[#allocation3 + $0x18] sm:$0xff] (%p1765_p13), %v488_v59 }
  0xd3   : >> { %v465_v38 = vadd.f32 %v462_v29, %v461_v27  ;;  %v1945_v29 = vmov %v488_v59  ;;  %v1946_v28 = vmov %v487_v21  ;;  %v1947_v27 = vmov %v486_v20  ;;  %501 = vst [vmem:[#allocation4] sm:$0xff] (%p1765_p13), %v489_v60  ;;  %502 = vst [vmem:[#allocation4 + $0x8] sm:$0xff] (%p1765_p13), %v490_v61 }
  0xd4   : >> { %v1948_v26 = vmov %v485_v11  ;;  %v1949_v25 = vmov %v1932_v48  ;;  %v1950_v24 = vmov %v1931_v47  ;;  %v1951_v23 = vmov %v1930_v54  ;;  %503 = vst [vmem:[#allocation4 + $0x10] sm:$0xff] (%p1765_p13), %v491_v62  ;;  %504 = vst [vmem:[#allocation4 + $0x18] sm:$0xff] (%p1765_p13), %v492_v63 }
  0xd5   : >> { %v466_v36 = vadd.f32 %v465_v38, %v463_v34  ;;  %v1952_v22 = vmov %v1929_v53 }
  0xd7   : >> { %v467_v39 = vadd.f32 %v466_v36, %v464_v37 }
  0xd9   : >> { %v468_v40 = vrot.slane %v467_v39, 4 }
  0xdb   : >> { %v469_v41 = vadd.f32 %v468_v40, %v467_v39 }
  0xdd   : >> { %v470_v42 = vrot.slane %v469_v41, 2 }
  0xdf   : >> { %v471_v43 = vadd.f32 %v470_v42, %v469_v41 }
  0xe1   : >> { %v472_v44 = vrot.slane %v471_v43, 1  ;;  %332 = sbr.rel (!%p1765_p13) target bundleno = 173 (0xad), region = 114 }
  0xe3   : >> { %v473_v46 = vadd.f32 %v472_v44, %v471_v43 }
  0xe5   : >> { %v474_v50 = vadd.f32 %v473_v46, %v1939_v45 }
  0xe7   : >> { %476 = vst [vmem:[%s475_s5] sm:$0x1] %v474_v50 }
  0xe8   : > { %1046 = shalt.err (!%p1043_p2)
}
  0xe9   : > { %s1047_s26 = scalar_lea.hbm %s1813_s12, 4096  ;;  %s1051_s30 = scalar_lea.hbm %s1955_s25, 16384 }
  0xea   : > { %p1048_p4 = scmp.ne.s32.totalorder %s1813_s12, %s1047_s26  ;;  %p1052_p5 = scmp.lt.u32.totalorder %s1813_s12, %s1955_s25 }
  0xeb   : > { %p1053_p7 = scmp.lt.u32.totalorder %s1051_s30, %s1047_s26  ;;  %p1055_p12 = scmp.lt.u32.totalorder %s1047_s26, %s1813_s12 }
  0xec   : > { %p1049_p8 = pnand %p1048_p4, %p1956_p1 }
  0xed   : > { %p1054_p13 = por %p1053_p7, %p1052_p5 }
  0xee   : > { %p1050_p3 = pneg %p1049_p8 }
  0xef   : > { %p1056_p9 = por %p1055_p12, %p1054_p13 }
  0xf1   : > { %p1057_p11 = pnand %p1056_p9, %p1050_p3 }
  0xf3   : > { %1060 = shalt.err (!%p1057_p11)
}
  0xf4   : > { %s1279_s0 = smov 128   ;;  %s1280_s5 = smov 256  }
  0xf5   : > { %s1281_s17 = smov 8  }
  0xf6   : > { %724 = dma.vmem_to_hbm [thread:$0]  (%p1956_p1), %s1808_s15, 4096, %s1813_s12, %s506_s27, %s1279_s0, %s1280_s5, %s1281_s17  }
  0xf7 PF: > { %s1957_s7 = sld [smem:[#allocation19_spill]]  ;;  %s1958_s1 = sld [smem:[#allocation16_spill]] }
  0xf8   : > { %s1959_s8 = sld [smem:[#allocation25_spill]] }
  0xfd   : > { %p741_p0 = scmp.ge.s32.totalorder %s1957_s7, 2  ;;  %s536_s9 = sand.u32 1, %s1958_s1  }
  0xfe   : > { %p1960_p6 = scmp.ne.s32.totalorder %s1959_s8, 0  ;;  %s537_s24 = scalar_lea.sflag [#allocation7], %s536_s9 }
 0x100   : > { %p737_p10 = pnand %p741_p0, %p1960_p6 }
 0x102   : > { %1170 = dma.done.wait (!%p737_p10), %s537_s24, 4096  }
 0x103   : > { %1172 = vsyncadd (!%p737_p10), %s537_s24, 4294963200  ;;  %s22_s22 = sadd.s32 1, %s1957_s7   ;;  %s1961_s6 = sld [smem:[#allocation23_spill]] }
 0x104   : > { %p19_p2 = scmp.ge.s32.totalorder %s22_s22, 6   ;;  %s1962_s29 = sld [smem:[#allocation17_spill]] }
 0x105   : > { %s1963_s17 = sld [smem:[#allocation22_spill]]  ;;  %s1964_s11 = sld [smem:[#allocation20_spill]] }
 0x106   : > { %s1965_s27 = sld [smem:[#allocation21_spill]]  ;;  %s1966_s12 = smov %s1179_s13 }
 0x107   : > { %s1967_s13 = smov %s1183_s14  ;;  %s1969_s15 = smov %s1191_s16 }
 0x108   : > { %s1971_s18 = smov %s1207_s20  ;;  %s1972_s19 = smov %s1211_s21 }
 0x109   : > { %s1968_s14 = smov %s1961_s6  ;;  %21 = sbr.rel (!%p19_p2) target bundleno = 15 (0xf), region = 125 }
 0x10a   : > { %s1970_s16 = smov %s1962_s29 }
 0x10b   : > { %s1973_s20 = smov %s1964_s11 }
 0x10c   : > { %s1974_s21 = smov %s1965_s27 }
 0x110   :  { %542 = vsyncpa [#allocation6], 1 }
 0x111   :  { %544 = vsyncpa [#allocation6 + $0x1], 1 }
 0x112   :  { %545 = vsyncpa [#allocation9], 1 }
 0x113   :  { %547 = vsyncpa [#allocation9 + $0x1], 1 }
 0x114   :  { %548 = vsyncpa [#allocation7], 1 }
 0x115   :  { %550 = vsyncpa [#allocation7 + $0x1], 1 }

</bundles_post_ra>
